<compile_context>
chip_gen: v7x
topology: tpu7x:2x2x1
jax: 0.10.0
libtpu: 0.0.40
codegen_flags: <defaults>
</compile_context>

<pallas_src>
import functools

import jax
import jax.numpy as jnp
from jax.experimental import pallas as pl
from jax.experimental.pallas import tpu as pltpu


def _round_up(x, m):
    return (x + m - 1) // m * m


def _vmem_budget_bytes():
    # Per-generation VMEM budget with headroom below physical capacity
    # (v5e/v6e: 128 MiB -> ~96 MiB, v7x: 64 MiB -> ~48 MiB).  Falls back to the
    # v7x-safe number if the query is unavailable.
    try:
        phys = pltpu.get_tpu_info().vmem_capacity_bytes
    except Exception:
        phys = 64 * 1024 * 1024
    return min(int(phys * 3 // 4), 96 * 1024 * 1024)


def _pick_tb(b_p, max_tb, fits):
    """Largest multiple-of-8 divisor of b_p that is <= max_tb and fits VMEM,
    preferring an even number of grid steps (v7x has 2 TensorCores/chip)."""
    limit = min(b_p, max(max_tb, 8))
    cands = [t for t in range(8, limit + 1, 8) if b_p % t == 0 and fits(t)]
    if not cands:
        return 8
    even = [t for t in cands if (b_p // t) % 2 == 0]
    return max(even) if even else max(cands)


def _kap_kernel(x_ref, w_ref, b_ref, o_ref):
    # x_ref: (tb, K*D_in)        f32  (streamed per grid step)
    # w_ref: (K*D_in, K*D_out_p) bf16 (block-diagonal, VMEM-resident)
    # b_ref: (1, K*D_out_p)      f32  (VMEM-resident)
    # o_ref: (tb, K*D_out_p)     out dtype (lane-dense, unmasked stores)
    x = x_ref[...].astype(w_ref.dtype)          # in-kernel cast (hidden under DMA)
    acc = jnp.dot(x, w_ref[...], preferred_element_type=jnp.float32)
    o_ref[...] = (acc + b_ref[...]).astype(o_ref.dtype)


@functools.partial(jax.jit, static_argnames=("compute_dtype", "out_dtype", "max_tb"))
def kap_embedding(x, weights, biases, *, compute_dtype=jnp.bfloat16,
                  out_dtype=None, max_tb=1024):
    """
    x       : [B, num_k, D_in]       float32
    weights : [num_k, D_out, D_in]   (PyTorch nn.Linear weight layout, per k)
    biases  : [num_k, D_out]
    returns : [B, num_k, D_out]      (out_dtype, default x.dtype)

    Precision contract: the matmul runs with `compute_dtype` (default bf16) MXU
    inputs and f32 accumulation + f32 bias add.  Pass compute_dtype=jnp.float32
    for a full-precision path.
    """
    B, num_k, d_in = x.shape
    _, d_out, _ = weights.shape
    out_dtype = x.dtype if out_dtype is None else out_dtype

    d_out_p = _round_up(d_out, 128)      # lane-dense output blocks
    kd_in = num_k * d_in
    kd_out = num_k * d_out_p

    # ---- one-time weight/bias prep (tiny; in a real model store pre-packed) ----
    w_t = jnp.transpose(weights, (0, 2, 1))                       # [K, D_in, D_out]
    if d_out_p != d_out:
        w_t = jnp.pad(w_t, ((0, 0), (0, 0), (0, d_out_p - d_out)))
    # Block-diagonal packing -> one lane-dense MXU matmul instead of K small ones.
    eye = jnp.eye(num_k, dtype=w_t.dtype)
    w_bd = jnp.einsum("kio,kl->kilo", w_t, eye)                   # [K, D_in, K, D_out_p]
    w_bd = w_bd.reshape(kd_in, kd_out).astype(compute_dtype)
    b_p = biases.astype(jnp.float32)
    if d_out_p != d_out:
        b_p = jnp.pad(b_p, ((0, 0), (0, d_out_p - d_out)))
    b_flat = b_p.reshape(1, kd_out)

    # x stays f32 in HBM; flattening the contiguous (num_k, D_in) trailing dims is free.
    x_flat = x.reshape(B, kd_in)

    # ---- batch tile selection with an honest VMEM footprint ----
    in_b = jnp.dtype(x.dtype).itemsize
    out_b = jnp.dtype(out_dtype).itemsize
    w_b = jnp.dtype(compute_dtype).itemsize
    kd_in_lanes = _round_up(kd_in, 128)                    # lane padding of x blocks
    kd_in_w = _round_up(kd_in, 16 if w_b == 2 else 8)      # weight sublane padding

    def footprint(tb):
        return (2 * tb * kd_in_lanes * in_b        # x block   (double-buffered)
                + 2 * tb * kd_out * out_b          # out block (double-buffered)
                + 2 * kd_in_w * kd_out * w_b       # block-diag weight (count 2 buffers)
                + 2 * 8 * kd_out * 4)              # bias (sublane-padded)

    budget = _vmem_budget_bytes()
    target = (budget * 9) // 10                    # leave headroom for Mosaic scratch

    B_p = _round_up(B, 8)
    if B_p != B:
        # TODO(synk): handle the ragged final batch tile with a masked last block
        # instead of materializing a padded copy of x.
        x_flat = jnp.pad(x_flat, ((0, B_p - B), (0, 0)))

    tb = _pick_tb(B_p, max_tb, lambda t: footprint(t) <= target)

    out_flat = pl.pallas_call(
        _kap_kernel,
        out_shape=jax.ShapeDtypeStruct((B_p, kd_out), out_dtype),
        grid_spec=pltpu.PrefetchScalarGridSpec(
            num_scalar_prefetch=0,
            grid=(B_p // tb,),
            in_specs=[
                # x: one lane-dense batch tile per grid step.
                pl.BlockSpec((tb, kd_in), lambda i: (i, 0)),
                # Weight / bias: constant index_map -> fetched once, VMEM-resident.
                pl.BlockSpec((kd_in, kd_out), lambda i: (0, 0)),
                pl.BlockSpec((1, kd_out), lambda i: (0, 0)),
            ],
            out_specs=pl.BlockSpec((tb, kd_out), lambda i: (i, 0)),
        ),
        compiler_params=pltpu.CompilerParams(
            dimension_semantics=("parallel",),     # batch tiles are independent
            vmem_limit_bytes=budget,
        ),
    )(x_flat, w_bd, b_flat)

    # Free contiguous reshape back to [B, K, D_out_p]; slice off any padding.
    out = out_flat.reshape(B_p, num_k, d_out_p)
    if B_p != B or d_out_p != d_out:
        out = out[:B, :, :d_out]
    return out


def _reference(x, weights, biases):
    # Pure-JAX f32 reference of the PyTorch forward:
    # out[b,k,:] = x[b,k,:] @ W_k^T + b_k
    return jnp.einsum("bki,koi->bko", x, weights) + biases[None, :, :]


if __name__ == "__main__":
    key = jax.random.PRNGKey(0)
    # Small, module-consistent, TPU-friendly shapes:
    #   B=32 (sublane-aligned), num_k=4, D_in=32, D_out=128.
    #   Flattened: x [32, 128], block-diag W [128, 512], out [32, 512] (lane-dense).
    B, num_k, d_in, d_out = 32, 4, 32, 128

    kx, kw, kb = jax.random.split(key, 3)
    x = jax.random.normal(kx, (B, num_k, d_in), dtype=jnp.float32)
    # nn.Linear layout: weight [out, in], bias [out], per k.
    weights = jax.random.normal(kw, (num_k, d_out, d_in), dtype=jnp.float32) * 0.05
    biases = jax.random.normal(kb, (num_k, d_out), dtype=jnp.float32) * 0.05

    # max_tb=16 -> grid=(2,): exercises the multi-step pipeline (and an even grid
    # split for v7x's two TensorCores) with VMEM-resident weights.
    out = kap_embedding(x, weights, biases, max_tb=16)
    jax.block_until_ready(out)

    ref = _reference(x, weights, biases)
    assert out.shape == (B, num_k, d_out), out.shape
    err = float(jnp.max(jnp.abs(out.astype(jnp.float32) - ref)))
    # bf16 MXU inputs with f32 accumulation -> looser tolerance vs f32 reference.
    assert err < 5e-2, err

    print("KERNEL_OK")
</pallas_src>

<mosaic_0001>
module attributes {stable_mosaic.version = 11 : i64} {
  func.func @_kap_kernel(%arg0: i32, %arg1: memref<16x128xf32, #tpu.memory_space<vmem>>, %arg2: memref<128x512xbf16, #tpu.memory_space<vmem>>, %arg3: memref<1x512xf32, #tpu.memory_space<vmem>>, %arg4: memref<16x512xf32, #tpu.memory_space<vmem>>) attributes {dimension_semantics = [#tpu.dimension_semantics<parallel>], iteration_bounds = array<i64: 2>, scalar_prefetch = 0 : i64, scratch_operands = 0 : i64, tpu.core_type = #tpu.core_type<tc>, window_params = [{transform_indices = @transform_0, window_bounds = array<i64: 16, 128>}, {pipeline_mode = #tpu.pipeline_mode<synchronous>, transform_indices = @transform_1, window_bounds = array<i64: 128, 512>}, {pipeline_mode = #tpu.pipeline_mode<synchronous>, transform_indices = @transform_2, window_bounds = array<i64: 1, 512>}, {transform_indices = @transform_3, window_bounds = array<i64: 16, 512>}]} {
    %c0 = arith.constant 0 : index
    %c0_0 = arith.constant 0 : index
    %0 = vector.load %arg1[%c0, %c0_0] : memref<16x128xf32, #tpu.memory_space<vmem>>, vector<16x128xf32>
    %1 = arith.truncf %0 : vector<16x128xf32> to vector<16x128xbf16>
    %c0_1 = arith.constant 0 : index
    %c0_2 = arith.constant 0 : index
    %2 = vector.load %arg2[%c0_1, %c0_2] : memref<128x512xbf16, #tpu.memory_space<vmem>>, vector<128x512xbf16>
    %cst = arith.constant dense<0.000000e+00> : vector<16x512xf32>
    %3 = tpu.matmul %1, %2, %cst {dimension_numbers = #tpu.dot_dimension_numbers<[1], [0], [0], [1], [0, 0, 1, 1], [], []>} : vector<16x128xbf16>, vector<128x512xbf16>, vector<16x512xf32> -> vector<16x512xf32>
    %c0_3 = arith.constant 0 : index
    %c0_4 = arith.constant 0 : index
    %4 = vector.load %arg3[%c0_3, %c0_4] : memref<1x512xf32, #tpu.memory_space<vmem>>, vector<1x512xf32>
    %5 = vector.broadcast %4 : vector<1x512xf32> to vector<16x512xf32>
    %6 = arith.addf %3, %5 : vector<16x512xf32>
    %c0_5 = arith.constant 0 : index
    %c0_6 = arith.constant 0 : index
    %7 = vector.load %arg4[%c0_5, %c0_6] : memref<16x512xf32, #tpu.memory_space<vmem>>, vector<16x512xf32>
    tpu.vector_store %arg4[%c0_5, %c0_6], %6 {strides = array<i32>} : memref<16x512xf32, #tpu.memory_space<vmem>>, vector<16x512xf32>,
    return
  }
  func.func @transform_0(%arg0: i32) -> (i32, i32) {
    %c0_i32 = arith.constant 0 : i32
    %c0_i32_0 = arith.constant 0 : i32
    return %arg0, %c0_i32 : i32, i32
  }
  func.func @transform_1(%arg0: i32) -> (i32, i32) {
    %c0_i32 = arith.constant 0 : i32
    %c0_i32_0 = arith.constant 0 : i32
    %c0_i32_1 = arith.constant 0 : i32
    return %c0_i32, %c0_i32_0 : i32, i32
  }
  func.func @transform_2(%arg0: i32) -> (i32, i32) {
    %c0_i32 = arith.constant 0 : i32
    %c0_i32_0 = arith.constant 0 : i32
    %c0_i32_1 = arith.constant 0 : i32
    return %c0_i32, %c0_i32_0 : i32, i32
  }
  func.func @transform_3(%arg0: i32) -> (i32, i32) {
    %c0_i32 = arith.constant 0 : i32
    %c0_i32_0 = arith.constant 0 : i32
    return %arg0, %c0_i32 : i32, i32
  }
}

</mosaic_0001>

<bundles_post_ra>
// kernel: kap_embedding.1
= control target key start
LH: loop header
LB: loop body
LE: loop exit
PB: predicated region body
PF: predicated region fallthrough
CT: control target
= control target key end

     0   :  { %s677_s12 = smov 0   ;;  %s799_s0 = inlined_call_operand.vmem [shape: f32[32,128], index: 0, kind: input, shape index: {}]   ;;  %s800_s1 = inlined_call_operand.vmem [shape: bf16[128,512], index: 1, kind: input, shape index: {}]   ;;  %s801_s2 = inlined_call_operand.vmem [shape: f32[1,512], index: 2, kind: input, shape index: {}]   ;;  %s802_s3 = inlined_call_operand.vmem [shape: f32[32,512], index: 3, kind: output, shape index: {}]  }
   0x1 LB: > { %s546_s13 = sadd.s32 4294967295, %s654_s12   ;;  %p550_p0 = scmp.ge.s32.totalorder %s654_s12, 1  ;;  %s654_s12 = sphi %s677_s12, %s13_s12  }
   0x2   : > { %p138_p1 = scmp.lt.s32.totalorder %s654_s12, 3 }
   0x4   : > { %p139_p2 = pnand %p550_p0, %p138_p1 }
   0x5   : > { %v600_v0 = vld [vmem:[%s800_s1 + $0x4] ss:$16 sps:$4 sm:$0xff] (!%p139_p2)   ;;  %v602_v1 = vld [vmem:[%s800_s1 + $0xc] ss:$16 sps:$4 sm:$0xff] (!%p139_p2)   ;;  %v656_v2 = vmov (!%p139_p2), 0   ;;  %s551_s19 = sshll.u32 (!%p139_p2), %s546_s13, 1  ;;  %v214_v36 = vlaneseq (!%p139_p2) }
   0x6   : > { %142 = sbr.rel (%p139_p2) target bundleno = 257 (0x101), region = 32  ;;  %426 = vmatprep.mubr.bf16.mxu0 (!%p139_p2), %v656_v2  ;;  %469 = vmatprep.mubr.bf16.mxu1 (!%p139_p2), %v656_v2  ;;  %v604_v3 = vld [vmem:[%s800_s1] ss:$16 sps:$4 sm:$0xff] (!%p139_p2)   ;;  %v605_v4 = vld [vmem:[%s800_s1 + $0x8] ss:$16 sps:$4 sm:$0xff] (!%p139_p2)   ;;  %p164_p3 = scmp.lt.s32.totalorder (!%p139_p2), %s551_s19, 3 }
   0x7   : > { %394 = vmatprep.subr.bf16.mxu0 (!%p139_p2), %v600_v0  ;;  %437 = vmatprep.subr.bf16.mxu1 (!%p139_p2), %v602_v1  ;;  %v606_v5 = vld [vmem:[%s800_s1 + $0x24] ss:$16 sps:$4 sm:$0xff] (!%p139_p2)   ;;  %v608_v6 = vld [vmem:[%s800_s1 + $0x2c] ss:$16 sps:$4 sm:$0xff] (!%p139_p2)   ;;  %v610_v7 = vld [vmem:[%s800_s1 + $0x20] ss:$16 sps:$4 sm:$0xff] (!%p139_p2)  }
   0x8   : > { %395 = vmatpush1.bf16.msra.mxu0 (!%p139_p2), %v604_v3  ;;  %438 = vmatpush1.bf16.msra.mxu1 (!%p139_p2), %v605_v4  ;;  %v611_v8 = vld [vmem:[%s800_s1 + $0x28] ss:$16 sps:$4 sm:$0xff] (!%p139_p2)   ;;  %v612_v9 = vld [vmem:[%s800_s1 + $0x44] ss:$16 sps:$4 sm:$0xff] (!%p139_p2)   ;;  %v614_v10 = vld [vmem:[%s800_s1 + $0x4c] ss:$16 sps:$4 sm:$0xff] (!%p139_p2)  }
   0x9   : > { %396 = vmatprep.subr.bf16.mxu0 (!%p139_p2), %v606_v5  ;;  %439 = vmatprep.subr.bf16.mxu1 (!%p139_p2), %v608_v6  ;;  %v616_v11 = vld [vmem:[%s800_s1 + $0x40] ss:$16 sps:$4 sm:$0xff] (!%p139_p2)   ;;  %v617_v12 = vld [vmem:[%s800_s1 + $0x48] ss:$16 sps:$4 sm:$0xff] (!%p139_p2)   ;;  %v618_v13 = vld [vmem:[%s800_s1 + $0x64] ss:$16 sps:$4 sm:$0xff] (!%p139_p2)  }
   0xa   : > { %v620_v14 = vld [vmem:[%s800_s1 + $0x6c] ss:$16 sps:$4 sm:$0xff] (!%p139_p2)   ;;  %v622_v15 = vld [vmem:[%s800_s1 + $0x60] ss:$16 sps:$4 sm:$0xff] (!%p139_p2)   ;;  %v623_v16 = vld [vmem:[%s800_s1 + $0x68] ss:$16 sps:$4 sm:$0xff] (!%p139_p2)  }
   0xb   : > { %v624_v17 = vld [vmem:[%s800_s1 + $0x84] ss:$16 sps:$4 sm:$0xff] (!%p139_p2)   ;;  %v626_v18 = vld [vmem:[%s800_s1 + $0x8c] ss:$16 sps:$4 sm:$0xff] (!%p139_p2)   ;;  %v628_v19 = vld [vmem:[%s800_s1 + $0x80] ss:$16 sps:$4 sm:$0xff] (!%p139_p2)  }
   0xc   : > { %397 = vmatpush1.bf16.msra.mxu0 (!%p139_p2), %v610_v7  ;;  %440 = vmatpush1.bf16.msra.mxu1 (!%p139_p2), %v611_v8  ;;  %v629_v20 = vld [vmem:[%s800_s1 + $0x88] ss:$16 sps:$4 sm:$0xff] (!%p139_p2)   ;;  %v630_v21 = vld [vmem:[%s800_s1 + $0xa4] ss:$16 sps:$4 sm:$0xff] (!%p139_p2)   ;;  %v632_v22 = vld [vmem:[%s800_s1 + $0xac] ss:$16 sps:$4 sm:$0xff] (!%p139_p2)  }
   0xd   : > { %398 = vmatprep.subr.bf16.mxu0 %v612_v9  ;;  %441 = vmatprep.subr.bf16.mxu1 %v614_v10  ;;  %s804_s19 = smov (!%p164_p3, %s551_s19), 3  ;;  %v634_v23 = vld [vmem:[%s800_s1 + $0xa0] ss:$16 sps:$4 sm:$0xff]   ;;  %v635_v24 = vld [vmem:[%s800_s1 + $0xa8] ss:$16 sps:$4 sm:$0xff]   ;;  %v215_v37 = vshrl.u32 %v214_v36, 7 }
   0xe   : > { %v636_v25 = vld [vmem:[%s800_s1 + $0xc4] ss:$16 sps:$4 sm:$0xff]   ;;  %v638_v26 = vld [vmem:[%s800_s1 + $0xcc] ss:$16 sps:$4 sm:$0xff]   ;;  %s552_s16 = sshll.u32 %s804_s19, 3  ;;  %s590_s7 = sshll.u32 %s804_s19, 5 }
   0xf   : > { %v640_v27 = vld [vmem:[%s800_s1 + $0xc0] ss:$16 sps:$4 sm:$0xff]   ;;  %v641_v28 = vld [vmem:[%s800_s1 + $0xc8] ss:$16 sps:$4 sm:$0xff]   ;;  %v642_v29 = vld [vmem:[%s800_s1 + $0xe4] ss:$16 sps:$4 sm:$0xff]   ;;  %s167_s13 = scalar_lea.vmem %s799_s0, %s552_s16  ;;  %s174_s10 = scalar_lea.vmem %s802_s3, %s590_s7 }
  0x10   : > { %399 = vmatpush1.bf16.msra.mxu0 %v616_v11  ;;  %442 = vmatpush1.bf16.msra.mxu1 %v617_v12  ;;  %v644_v30 = vld [vmem:[%s800_s1 + $0xec] ss:$16 sps:$4 sm:$0xff]   ;;  %v646_v31 = vld [vmem:[%s800_s1 + $0xe0] ss:$16 sps:$4 sm:$0xff]   ;;  %v647_v32 = vld [vmem:[%s800_s1 + $0xe8] ss:$16 sps:$4 sm:$0xff]  }
  0x11   : > { %400 = vmatprep.subr.bf16.mxu0 %v618_v13  ;;  %443 = vmatprep.subr.bf16.mxu1 %v620_v14  ;;  %v177_v33 = vld [vmem:[%s167_s13] sm:$0xff]  ;;  %v178_v34 = vld [vmem:[%s167_s13 + $0x8] sm:$0xff]  ;;  %v216_v38 = vsub.s32 0, %v215_v37  ;;  %v224_v39 = vsub.s32 2, %v215_v37  ;;  %v220_v41 = vsub.s32 1, %v215_v37  ;;  %v228_v42 = vsub.s32 3, %v215_v37 }
  0x12   : > { %v179_v35 = vpack.c.bf16 %v178_v34, %v177_v33  ;;  %v212_v40 = vld [vmem:[%s801_s2] sm:$0xf] }
  0x13   : > { %v217_v43 = vrot.slane %v212_v40, %v216_v38  ;;  %v225_v44 = vrot.slane %v212_v40, %v224_v39  ;;  %v221_v45 = vrot.slane %v212_v40, %v220_v41  ;;  %v229_v46 = vrot.slane %v212_v40, %v228_v42 }
  0x14   : > { %401 = vmatpush1.bf16.msra.mxu0 %v622_v15  ;;  %444 = vmatpush1.bf16.msra.mxu1 %v623_v16 }
  0x15   : > { %402 = vmatprep.subr.bf16.mxu0 %v624_v17  ;;  %445 = vmatprep.subr.bf16.mxu1 %v626_v18 }
  0x18   : > { %403 = vmatpush1.bf16.msra.mxu0 %v628_v19  ;;  %446 = vmatpush1.bf16.msra.mxu1 %v629_v20 }
  0x19   : > { %404 = vmatprep.subr.bf16.mxu0 %v630_v21  ;;  %447 = vmatprep.subr.bf16.mxu1 %v632_v22 }
  0x1c   : > { %405 = vmatpush1.bf16.msra.mxu0 %v634_v23  ;;  %448 = vmatpush1.bf16.msra.mxu1 %v635_v24 }
  0x1d   : > { %406 = vmatprep.subr.bf16.mxu0 %v636_v25  ;;  %449 = vmatprep.subr.bf16.mxu1 %v638_v26 }
  0x20   : > { %407 = vmatpush1.bf16.msra.mxu0 %v640_v27  ;;  %450 = vmatpush1.bf16.msra.mxu1 %v641_v28 }
  0x21   : > { %408 = vmatprep.subr.bf16.mxu0 %v642_v29  ;;  %451 = vmatprep.subr.bf16.mxu1 %v644_v30 }
  0x24   : > { %409 = vmatpush1.bf16.msra.mxu0 %v646_v31  ;;  %452 = vmatpush1.bf16.msra.mxu1 %v647_v32 }
  0x27   : > { %427 = vmatmul.mubr.bf16.vlgmr.msra.gmra.mrb[0].mxu0 %v179_v35  ;;  %470 = vmatmul.mubr.bf16.vlgmr.msra.gmra.mrb[0].mxu1 %v179_v35 }
  0xfa   : > { %v428_v47 = vpop.f32.mrb[0].mxu0  ;;  %v471_v48 = vpop.f32.mrb[0].mxu1 }
  0xfb   : > { %v429_v49 = vadd.f32 %v428_v47, %v217_v43  ;;  %v472_v50 = vadd.f32 %v471_v48, %v225_v44  ;;  %v430_v51 = vpop.f32.mrb[1].mxu0  ;;  %v473_v52 = vpop.f32.mrb[1].mxu1 }
  0xfc   : > { %v431_v53 = vadd.f32 %v430_v51, %v221_v45  ;;  %v474_v54 = vadd.f32 %v473_v52, %v229_v46  ;;  %v432_v55 = vpop.f32.mrb[2].mxu0  ;;  %v475_v56 = vpop.f32.mrb[2].mxu1 }
  0xfd   : > { %480 = vst [vmem:[%s174_s10] sm:$0xff] %v429_v49  ;;  %482 = vst [vmem:[%s174_s10 + $0x10] sm:$0xff] %v472_v50  ;;  %v433_v57 = vadd.f32 %v432_v55, %v217_v43  ;;  %v476_v58 = vadd.f32 %v475_v56, %v225_v44  ;;  %v434_v59 = vpop.f32.mrb[3].mxu0  ;;  %v477_v60 = vpop.f32.mrb[3].mxu1 }
  0xfe   : > { %481 = vst [vmem:[%s174_s10 + $0x8] sm:$0xff] %v431_v53  ;;  %483 = vst [vmem:[%s174_s10 + $0x18] sm:$0xff] %v474_v54  ;;  %v435_v61 = vadd.f32 %v434_v59, %v221_v45  ;;  %v478_v62 = vadd.f32 %v477_v60, %v229_v46 }
  0xff   : > { %484 = vst [vmem:[%s174_s10 + $0x20] sm:$0xff] %v433_v57  ;;  %486 = vst [vmem:[%s174_s10 + $0x30] sm:$0xff] %v476_v58 }
 0x100   : > { %485 = vst [vmem:[%s174_s10 + $0x28] sm:$0xff] %v435_v61  ;;  %487 = vst [vmem:[%s174_s10 + $0x38] sm:$0xff] %v478_v62 }
 0x101 PF: > { %s13_s12 = sadd.s32 1, %s654_s12  }
 0x102   : > { %p10_p4 = scmp.ge.s32.totalorder %s13_s12, 4  }
 0x104   :  { %12 = sbr.rel (!%p10_p4) target bundleno = 1 (0x1), region = 62 }

</bundles_post_ra>
